<compile_context>
chip_gen: v6e
topology: v6e:2x2x1
jax: 0.10.0
libtpu: 0.0.40
codegen_flags: <defaults>
</compile_context>

<pallas_src>
import jax
import jax.numpy as jnp
from jax import lax
from jax.experimental import pallas as pl


def vanet_kernel(x_ref, wb1_ref, head_ref, q_ref):
    """Fused dueling-DQN forward.

    x_ref    : [B, S]      input states
    wb1_ref  : [S+1, H]    rows 0..S-1 = W1 ([in, out] layout), row S = b1
    head_ref : [A+2, H]    rows 0..A-1 = Wa^T, row A = Wv^T,
                           row A+1 = [ba..., bv, 0...] (biases in first A+1 lanes)
    q_ref    : [B, A]      Q-values
    """
    B, S = x_ref.shape
    H = wb1_ref.shape[1]
    A = q_ref.shape[1]

    x = x_ref[...]  # [B, S]

    # ---- Layer 1 on the MXU: K = S = 4 (MXU is otherwise idle here) ----
    w1 = wb1_ref[:S, :]          # [S, H]
    b1 = wb1_ref[S:S + 1, :]     # [1, H] (sublane-broadcast add)
    h = jnp.maximum(
        jnp.dot(x, w1, preferred_element_type=jnp.float32) + b1, 0.0)  # [B, H]

    # ---- Fused A|V head: lane-dense weights [A+1, H], contract over H ----
    w_head = head_ref[:A + 1, :]            # [A+1, H]
    b_head = head_ref[A + 1:A + 2, :A + 1]  # [1, A+1]
    av = lax.dot_general(
        h, w_head,
        dimension_numbers=(((1,), (1,)), ((), ())),   # h @ w_head.T
        preferred_element_type=jnp.float32) + b_head  # [B, A+1]

    a = av[:, :A]                 # advantage stream [B, A]
    v = av[:, A:A + 1]            # value stream     [B, 1]
    q_ref[...] = (v + a - jnp.mean(a, axis=1, keepdims=True)).astype(q_ref.dtype)


def pack_params(w1, b1, wa, ba, wv, bv):
    """Pack parameters into two lane-dense slabs.  Run ONCE per parameter update,
    not per forward call (hoisted out of the hot path per perf review).

    Weights are in [in, out] layout (transposed from PyTorch), biases as [1, out].
    Returns:
      wb1  : [S+1, H]  W1 rows + b1 row
      head : [A+2, H]  Wa^T rows, Wv^T row, bias row (first A+1 lanes used)
    """
    H = w1.shape[1]
    A = wa.shape[1]
    wb1 = jnp.concatenate([w1, b1], axis=0)                    # [S+1, H]
    w_head = jnp.concatenate([wa.T, wv.T], axis=0)             # [A+1, H]
    head_bias = jnp.concatenate([ba, bv], axis=1)[0]           # [A+1]
    bias_row = jnp.zeros((1, H), dtype=w1.dtype).at[0, :A + 1].set(head_bias)
    head = jnp.concatenate([w_head, bias_row], axis=0)         # [A+2, H]
    return wb1, head


@jax.jit
def vanet_forward(x, wb1, head):
    """Forward pass on pre-packed slabs (see pack_params)."""
    B = x.shape[0]
    A = head.shape[0] - 2

    full = lambda arr: pl.BlockSpec(arr.shape, lambda: (0,) * arr.ndim)

    # TODO(synk): if batch ever scales (training), add a parallel batch grid axis
    # (and on v7x dimension_semantics=("parallel",) to use both TCs); at B=8 the
    # kernel is launch-latency bound and a grid would be pure overhead.
    # TODO(synk): for the RL action-selection path, fuse argmax(Q) into this
    # kernel (extra int32 output) to amortize per-call launch overhead.
    return pl.pallas_call(
        vanet_kernel,
        out_shape=jax.ShapeDtypeStruct((B, A), jnp.float32),
        in_specs=[full(x), full(wb1), full(head)],
        out_specs=pl.BlockSpec((B, A), lambda: (0, 0)),
    )(x, wb1, head)


def vanet_reference(x, w1, b1, wa, ba, wv, bv):
    h = jnp.maximum(x @ w1 + b1, 0.0)
    a = h @ wa + ba
    v = h @ wv + bv
    return v + a - jnp.mean(a, axis=1, keepdims=True)


if __name__ == "__main__":
    # CartPole-v1: state_dim=4, action_dim=2; hidden_dim=128 per the module.
    batch, state_dim, hidden_dim, action_dim = 8, 4, 128, 2

    key = jax.random.PRNGKey(0)
    k_x, k_w1, k_b1, k_wa, k_ba, k_wv, k_bv = jax.random.split(key, 7)

    x = jax.random.normal(k_x, (batch, state_dim), dtype=jnp.float32)
    # Deterministic parameter init (synthetic, not a checkpoint load).
    w1 = jax.random.normal(k_w1, (state_dim, hidden_dim), dtype=jnp.float32) * 0.1
    b1 = jax.random.normal(k_b1, (1, hidden_dim), dtype=jnp.float32) * 0.1
    wa = jax.random.normal(k_wa, (hidden_dim, action_dim), dtype=jnp.float32) * 0.1
    ba = jax.random.normal(k_ba, (1, action_dim), dtype=jnp.float32) * 0.1
    wv = jax.random.normal(k_wv, (hidden_dim, 1), dtype=jnp.float32) * 0.1
    bv = jax.random.normal(k_bv, (1, 1), dtype=jnp.float32) * 0.1

    # Packing happens once, outside the per-step forward path.
    wb1, head = pack_params(w1, b1, wa, ba, wv, bv)
    wb1, head = jax.block_until_ready((wb1, head))

    q = vanet_forward(x, wb1, head)
    q = jax.block_until_ready(q)

    q_ref = vanet_reference(x, w1, b1, wa, ba, wv, bv)
    assert q.shape == (batch, action_dim)
    assert jnp.allclose(q, q_ref, atol=1e-4, rtol=1e-4), "mismatch vs reference"

    print("KERNEL_OK")
</pallas_src>

<mosaic_0001>
module attributes {stable_mosaic.version = 11 : i64} {
  func.func @vanet_kernel(%arg0: memref<8x4xf32, #tpu.memory_space<vmem>>, %arg1: memref<5x128xf32, #tpu.memory_space<vmem>>, %arg2: memref<4x128xf32, #tpu.memory_space<vmem>>, %arg3: memref<8x2xf32, #tpu.memory_space<vmem>>) attributes {dimension_semantics = [], scalar_prefetch = 0 : i64, scratch_operands = 0 : i64, tpu.core_type = #tpu.core_type<tc>} {
    %c0 = arith.constant 0 : index
    %c0_0 = arith.constant 0 : index
    %0 = vector.load %arg0[%c0, %c0_0] : memref<8x4xf32, #tpu.memory_space<vmem>>, vector<8x4xf32>
    %c0_1 = arith.constant 0 : index
    %c0_2 = arith.constant 0 : index
    %1 = vector.load %arg1[%c0_1, %c0_2] : memref<5x128xf32, #tpu.memory_space<vmem>>, vector<4x128xf32>
    %c4 = arith.constant 4 : index
    %c0_3 = arith.constant 0 : index
    %2 = vector.load %arg1[%c4, %c0_3] : memref<5x128xf32, #tpu.memory_space<vmem>>, vector<1x128xf32>
    %cst = arith.constant dense<0.000000e+00> : vector<8x128xf32>
    %3 = tpu.matmul %0, %1, %cst {dimension_numbers = #tpu.dot_dimension_numbers<[1], [0], [0], [1], [0, 0, 1, 1], [], []>} : vector<8x4xf32>, vector<4x128xf32>, vector<8x128xf32> -> vector<8x128xf32>
    %4 = vector.broadcast %2 : vector<1x128xf32> to vector<8x128xf32>
    %5 = arith.addf %3, %4 : vector<8x128xf32>
    %cst_4 = arith.constant 0.000000e+00 : f32
    %6 = vector.broadcast %cst_4 : f32 to vector<8x128xf32>
    %7 = arith.maximumf %5, %6 : vector<8x128xf32>
    %c0_5 = arith.constant 0 : index
    %c0_6 = arith.constant 0 : index
    %8 = vector.load %arg2[%c0_5, %c0_6] : memref<4x128xf32, #tpu.memory_space<vmem>>, vector<3x128xf32>
    %c3 = arith.constant 3 : index
    %c0_7 = arith.constant 0 : index
    %9 = vector.load %arg2[%c3, %c0_7] : memref<4x128xf32, #tpu.memory_space<vmem>>, vector<1x3xf32>
    %cst_8 = arith.constant dense<0.000000e+00> : vector<8x3xf32>
    %10 = tpu.matmul %7, %8, %cst_8 {dimension_numbers = #tpu.dot_dimension_numbers<[1], [1], [0], [0], [0, 0, 1, 0], [], []>} : vector<8x128xf32>, vector<3x128xf32>, vector<8x3xf32> -> vector<8x3xf32>
    %11 = vector.broadcast %9 : vector<1x3xf32> to vector<8x3xf32>
    %12 = arith.addf %10, %11 : vector<8x3xf32>
    %13 = vector.extract_strided_slice %12 {offsets = [0, 0], sizes = [8, 2], strides = [1, 1]} : vector<8x3xf32> to vector<8x2xf32>
    %14 = vector.extract_strided_slice %12 {offsets = [0, 2], sizes = [8, 1], strides = [1, 1]} : vector<8x3xf32> to vector<8x1xf32>
    %15 = vector.broadcast %14 : vector<8x1xf32> to vector<8x2xf32>
    %16 = arith.addf %15, %13 : vector<8x2xf32>
    %cst_9 = arith.constant dense<0.000000e+00> : vector<8xf32>
    %17 = vector.multi_reduction <add>, %13, %cst_9 [1] : vector<8x2xf32> to vector<8xf32>
    %18 = vector.shape_cast %17 : vector<8xf32> to vector<8x1xf32>
    %cst_10 = arith.constant 2.000000e+00 : f32
    %19 = vector.broadcast %cst_10 : f32 to vector<8x1xf32>
    %20 = arith.divf %18, %19 : vector<8x1xf32>
    %21 = vector.broadcast %20 : vector<8x1xf32> to vector<8x2xf32>
    %22 = arith.subf %16, %21 : vector<8x2xf32>
    %c0_11 = arith.constant 0 : index
    %c0_12 = arith.constant 0 : index
    %23 = vector.load %arg3[%c0_11, %c0_12] : memref<8x2xf32, #tpu.memory_space<vmem>>, vector<8x2xf32>
    tpu.vector_store %arg3[%c0_11, %c0_12], %22 {strides = array<i32>} : memref<8x2xf32, #tpu.memory_space<vmem>>, vector<8x2xf32>,
    return
  }
}

</mosaic_0001>

<bundles_post_ra>
// kernel: vanet_forward.1
= control target key start
LH: loop header
LB: loop body
LE: loop exit
PB: predicated region body
PF: predicated region fallthrough
CT: control target
= control target key end

     0   :  { %vm25_vm0 = vcmask 1043456   ;;  %vm21_vm1 = vcmask 31744   ;;  %v216_v0 = vmov 0.0   ;;  %vm217_vm2 = vmmov 0   ;;  %s257_s1 = inlined_call_operand.vmem [shape: f32[5,128], index: 1, kind: input, shape index: {}]   ;;  %s258_s0 = inlined_call_operand.vmem [shape: f32[8,4], index: 0, kind: input, shape index: {}]   ;;  %s259_s2 = inlined_call_operand.vmem [shape: f32[4,128], index: 2, kind: input, shape index: {}]   ;;  %s260_s3 = inlined_call_operand.vmem [shape: f32[8,2], index: 3, kind: output, shape index: {}]  }
   0x1   :  { %202 = vmatprep.subr.mxu0 %v216_v0  ;;  %v15_v1 = vld [vmem:[%s257_s1] sm:$0xf]  ;;  %204 = vmatprep.mubr.msk.f32.mxu0 %vm217_vm2, %v216_v0  ;;  %v194_v4 = vld [vmem:[%s257_s1 + $0x4] ss:$0 sm:$0xff]  ;;  %v218_v9 = vmov 2   ;;  %vm182_vm3 = vcmask 15360  }
   0x2   :  { %v14_v2 = vld [vmem:[%s258_s0] sm:$0xff]  ;;  %203 = vmatpush3.msk.msra.mxu0 %vm25_vm0, %v15_v1  ;;  %207 = vmatprep.subr.mxu1 %v216_v0 }
   0x3   :  { %205 = vmatmul.mubr.msk.f32.vlgmr.msra.gmra.mxu0 %vm21_vm1, %v14_v2  ;;  %209 = vmatprep.mubr.msk.f32.mxu1 %vm217_vm2, %v216_v0  ;;  %v100_v3 = vld [vmem:[%s259_s2] sm:$0x7]  ;;  %v197_v10 = vld [vmem:[%s259_s2 + $0x3] ss:$0 sm:$0xff] }
   0x4   :  { %208 = vmatpush3.xpose.msra.mxu1 %v100_v3  ;;  %215 = vset.pattern.permute.xlu0 %v218_v9 }
  0xc3   :  { %v95_v5 = vpop.f32.mrf.mxu0 }
  0xc4   :  { %v96_v6 = vadd.f32 %v194_v4, %v95_v5 }
  0xc5   :  { %v206_v7 = vpop.f32.mrf.mxu0 }
  0xc6   :  { %v99_v8 = vmax.f32 %v96_v6, 0.0 }
  0xc8   :  { %210 = vmatmul.mubr.f32.vlgmr.msra.gmra.mxu1 %v99_v8 }
 0x188   :  { %v172_v11 = vpop.f32.mrf.mxu1 }
 0x189   :  { %v173_v12 = vadd.f32 %v197_v10, %v172_v11 }
 0x18a   :  { %v211_v13 = vpop.f32.mrf.mxu1 }
 0x18b   :  { %v183_v14 = vsel %vm182_vm3, %v173_v12, 0.0 }
 0x18c   :  { %184 = vadd.xlane.f32.xlu0 %v183_v14 }
 0x1a2   :  { %178 = vperm.xlu0 %215, %v173_v12  }
 0x215   :  { %v185_v15 = vpop.xlane.xlu0 %184 }
 0x216   :  { %v187_v17 = vmul.f32 0.5, %v185_v15 }
 0x21d   :  { %v179_v16 = vpop.permute.xlu0 %178 }
 0x21e   :  { %v181_v18 = vadd.f32 %v179_v16, %v173_v12 }
 0x220   :  { %v188_v19 = vsub.f32 %v181_v18, %v187_v17 }
 0x222   :  { %189 = vst.msk [vmem:[%s260_s3] sm:$0xff] %vm182_vm3, %v188_v19 }

</bundles_post_ra>
